<compile_context>
chip_gen: v5e
topology: v5e:2x2
jax: 0.10.0
libtpu: 0.0.40
codegen_flags: <defaults>
</compile_context>

<pallas_src>
import functools

import jax
import jax.numpy as jnp
from jax import lax
from jax.experimental import pallas as pl
from jax.experimental.pallas import tpu as pltpu


def _round_up(v, m):
    return (v + m - 1) // m * m


def _matmul_bias_kernel(x_ref, w_ref, b_ref, o_ref):
    """One (TM, TE) output tile; K is fully resident (no reduction grid axis)."""
    acc = jnp.dot(x_ref[...], w_ref[...], preferred_element_type=jnp.float32)
    o_ref[...] = (acc + b_ref[...].astype(jnp.float32)).astype(o_ref.dtype)


def _pick_tiles(M, K, E, out_itemsize, budget=24 * 1024 * 1024):
    """Pick (TM, TE). M is a multiple of 8. TE == E or a multiple of 128."""
    tm_opts = [t for t in (1024, 512, 256, 128, 64, 32, 16, 8) if t <= M] or [M]
    te_opts = [E] + [t for t in (1024, 512, 256, 128) if t < E]

    def bill(tm, te):
        # double-buffered bf16 inputs + f32 bias + double-buffered output tile
        return (2 * tm * K * 2 + 2 * K * te * 2 + 2 * te * 4
                + 2 * tm * te * out_itemsize)

    tm, te = tm_opts[-1], te_opts[-1]          # smallest as a fallback
    done = False
    for t_m in tm_opts:                        # prefer big TM, then TE == E
        for t_e in te_opts:
            if bill(t_m, t_e) <= budget:
                tm, te = t_m, t_e
                done = True
                break
        if done:
            break

    # v7x has 2 TensorCores sharded over the parallel axes: avoid a 1-tile grid.
    if pl.cdiv(M, tm) * pl.cdiv(E, te) == 1 and M >= 16:
        tm = _round_up(M // 2, 8)
    return tm, te


def _conv1x1_pallas(xm, wm, bvec, out_dtype):
    """xm: (M, K) bf16 rows, wm: (K, E) bf16 weights, bvec: (E,) bias -> (M, E)."""
    M, K = xm.shape
    E = wm.shape[1]
    out_itemsize = jnp.dtype(out_dtype).itemsize

    # Rarely needed: sublane-align M (<= 7 zero rows) so TM can be a multiple of 8.
    Mp = _round_up(M, 8)
    if Mp != M:
        xm = jnp.pad(xm, ((0, Mp - M), (0, 0)))

    TM, TE = _pick_tiles(Mp, K, E, out_itemsize)
    grid = (pl.cdiv(Mp, TM), pl.cdiv(E, TE))   # E innermost: x stays resident per M tile

    bb = bvec.astype(jnp.float32).reshape(1, E)

    cost = pl.CostEstimate(
        flops=2 * Mp * K * E,
        transcendentals=0,
        bytes_accessed=Mp * K * 2 + K * E * 2 + E * 4 + Mp * E * out_itemsize,
    )

    out = pl.pallas_call(
        _matmul_bias_kernel,
        out_shape=jax.ShapeDtypeStruct((Mp, E), out_dtype),
        grid_spec=pltpu.PrefetchScalarGridSpec(
            num_scalar_prefetch=0,
            grid=grid,
            in_specs=[
                # NOTE: if DMA is still exposed on v5e, add pipeline_mode=pl.Buffered(3) here.
                pl.BlockSpec((TM, K), lambda i, j: (i, 0)),
                pl.BlockSpec((K, TE), lambda i, j: (0, j)),
                pl.BlockSpec((1, TE), lambda i, j: (0, j)),
            ],
            out_specs=pl.BlockSpec((TM, TE), lambda i, j: (i, j)),
        ),
        compiler_params=pltpu.CompilerParams(
            dimension_semantics=("parallel", "parallel"),
            vmem_limit_bytes=32 * 1024 * 1024,
        ),
        cost_estimate=cost,
    )(xm, wm, bb)

    return out[:M] if Mp != M else out


def _avg_pool2(x, stride):
    """nn.AvgPool2d(2, stride, ceil_mode=True, count_include_pad=False), f32 accumulate."""
    _, _, H, W = x.shape

    def _out_size(n):
        o = -(-(n - 2) // stride) + 1          # ceil_mode output size
        if (o - 1) * stride >= n:              # drop windows starting past the input
            o -= 1
        return o

    Ho, Wo = _out_size(H), _out_size(W)
    ph = max(0, (Ho - 1) * stride + 2 - H)
    pw = max(0, (Wo - 1) * stride + 2 - W)

    sums = lax.reduce_window(
        x.astype(jnp.float32), jnp.array(0.0, jnp.float32), lax.add,
        (1, 1, 2, 2), (1, 1, stride, stride),
        ((0, 0), (0, 0), (0, ph), (0, pw)))

    if ph == 0 and pw == 0:
        return sums * jnp.float32(0.25)        # all windows are full 2x2

    # Analytic per-position counts (count_include_pad=False), tiny (Ho, Wo) map.
    ch = jnp.minimum(jnp.arange(Ho) * stride + 2, H) - jnp.arange(Ho) * stride
    cw = jnp.minimum(jnp.arange(Wo) * stride + 2, W) - jnp.arange(Wo) * stride
    cnt = (ch[:, None] * cw[None, :]).astype(jnp.float32)
    return sums / cnt[None, None, :, :]


@functools.partial(jax.jit, static_argnames=("stride", "dilation"))
def downsample_avg(x, weight, bias, *, stride=2, dilation=1):
    """DownsampleAvg.forward (preact=True): AvgPool2d(2, stride) -> 1x1 conv.

    x: (B, C_in, H, W), weight: (C_out, C_in, 1, 1), bias: (C_out,)
    returns: (B, C_out, H', W')
    """
    if dilation != 1:
        # TODO(synk): AvgPool2dSame (dilation > 1) branch not implemented.
        raise NotImplementedError("dilation > 1 (AvgPool2dSame) not supported")
    # TODO(synk): preact=False norm_layer branch not implemented (default is Identity).

    pooled = _avg_pool2(x, stride) if stride > 1 else x

    B, C, Hp, Wp = pooled.shape
    E = weight.shape[0]
    M = B * Hp * Wp

    # XLA glue over the 1/4-sized pooled tensor (see TODO at top for full fusion).
    xm = pooled.transpose(0, 2, 3, 1).reshape(M, C).astype(jnp.bfloat16)
    wm = weight.reshape(E, C).T.astype(jnp.bfloat16)       # (C, E)

    out = _conv1x1_pallas(xm, wm, bias, x.dtype)            # (M, E)
    # NCHW to match the PyTorch module; a consumer accepting NHWC could skip this pass.
    return out.reshape(B, Hp, Wp, E).transpose(0, 3, 1, 2)


if __name__ == "__main__":
    # Small shapes: batch=2, in_chs=4, 16x16 spatial, stride=2 downsample, out_chs=32.
    B, C_in, H, W = 2, 4, 16, 16
    C_out = 32
    stride = 2

    key = jax.random.PRNGKey(0)
    kx, kw, kb = jax.random.split(key, 3)
    x = jax.random.normal(kx, (B, C_in, H, W), dtype=jnp.float32)
    weight = jax.random.normal(kw, (C_out, C_in, 1, 1), dtype=jnp.float32) * 0.02
    bias = jax.random.normal(kb, (C_out,), dtype=jnp.float32) * 0.02

    out = downsample_avg(x, weight, bias, stride=stride)
    out = jax.block_until_ready(out)

    # Reference in plain f32 JAX: 2x2 mean pool (even dims) + 1x1 conv + bias.
    Ho, Wo = H // 2, W // 2
    ref_pool = x.reshape(B, C_in, Ho, 2, Wo, 2).mean(axis=(3, 5))
    ref = lax.conv_general_dilated(
        ref_pool, weight, window_strides=(1, 1), padding="VALID",
        dimension_numbers=("NCHW", "OIHW", "NCHW"))
    ref = ref + bias[None, :, None, None]

    assert out.shape == (B, C_out, Ho, Wo), out.shape
    max_err = float(jnp.max(jnp.abs(out - ref)))
    assert jnp.allclose(out, ref, atol=1e-2, rtol=1e-2), max_err

    print("KERNEL_OK")
</pallas_src>

<mosaic_0001>
module attributes {stable_mosaic.version = 11 : i64} {
  func.func @_matmul_bias_kernel(%arg0: i32, %arg1: i32, %arg2: memref<64x4xbf16, #tpu.memory_space<vmem>>, %arg3: memref<4x32xbf16, #tpu.memory_space<vmem>>, %arg4: memref<1x32xf32, #tpu.memory_space<vmem>>, %arg5: memref<64x32xf32, #tpu.memory_space<vmem>>) attributes {dimension_semantics = [#tpu.dimension_semantics<parallel>, #tpu.dimension_semantics<parallel>], iteration_bounds = array<i64: 2, 1>, scalar_prefetch = 0 : i64, scratch_operands = 0 : i64, tpu.core_type = #tpu.core_type<tc>, window_params = [{transform_indices = @transform_0, window_bounds = array<i64: 64, 4>}, {transform_indices = @transform_1, window_bounds = array<i64: 4, 32>}, {transform_indices = @transform_2, window_bounds = array<i64: 1, 32>}, {transform_indices = @transform_3, window_bounds = array<i64: 64, 32>}]} {
    %c0 = arith.constant 0 : index
    %c0_0 = arith.constant 0 : index
    %0 = vector.load %arg2[%c0, %c0_0] : memref<64x4xbf16, #tpu.memory_space<vmem>>, vector<64x4xbf16>
    %c0_1 = arith.constant 0 : index
    %c0_2 = arith.constant 0 : index
    %1 = vector.load %arg3[%c0_1, %c0_2] : memref<4x32xbf16, #tpu.memory_space<vmem>>, vector<4x32xbf16>
    %cst = arith.constant dense<0.000000e+00> : vector<64x32xf32>
    %2 = tpu.matmul %0, %1, %cst {dimension_numbers = #tpu.dot_dimension_numbers<[1], [0], [0], [1], [0, 0, 1, 1], [], []>} : vector<64x4xbf16>, vector<4x32xbf16>, vector<64x32xf32> -> vector<64x32xf32>
    %c0_3 = arith.constant 0 : index
    %c0_4 = arith.constant 0 : index
    %3 = vector.load %arg4[%c0_3, %c0_4] : memref<1x32xf32, #tpu.memory_space<vmem>>, vector<1x32xf32>
    %4 = vector.broadcast %3 : vector<1x32xf32> to vector<64x32xf32>
    %5 = arith.addf %2, %4 : vector<64x32xf32>
    %c0_5 = arith.constant 0 : index
    %c0_6 = arith.constant 0 : index
    %6 = vector.load %arg5[%c0_5, %c0_6] : memref<64x32xf32, #tpu.memory_space<vmem>>, vector<64x32xf32>
    tpu.vector_store %arg5[%c0_5, %c0_6], %5 {strides = array<i32>} : memref<64x32xf32, #tpu.memory_space<vmem>>, vector<64x32xf32>,
    return
  }
  func.func @transform_0(%arg0: i32, %arg1: i32) -> (i32, i32) {
    %c0_i32 = arith.constant 0 : i32
    %c0_i32_0 = arith.constant 0 : i32
    return %arg0, %c0_i32 : i32, i32
  }
  func.func @transform_1(%arg0: i32, %arg1: i32) -> (i32, i32) {
    %c0_i32 = arith.constant 0 : i32
    %c0_i32_0 = arith.constant 0 : i32
    return %c0_i32, %arg1 : i32, i32
  }
  func.func @transform_2(%arg0: i32, %arg1: i32) -> (i32, i32) {
    %c0_i32 = arith.constant 0 : i32
    %c0_i32_0 = arith.constant 0 : i32
    return %c0_i32, %arg1 : i32, i32
  }
  func.func @transform_3(%arg0: i32, %arg1: i32) -> (i32, i32) {
    %c0_i32 = arith.constant 0 : i32
    return %arg0, %arg1 : i32, i32
  }
}

</mosaic_0001>

<bundles_post_ra>
// kernel: downsample_avg.1
= control target key start
LH: loop header
LB: loop body
LE: loop exit
PB: predicated region body
PF: predicated region fallthrough
CT: control target
= control target key end

     0   :  { %8 = vsyncpa [#allocation3], 0  ;;  %s739_s0 = inlined_call_operand.vmem [shape: bf16[128,4], index: 0, kind: input, shape index: {}]   ;;  %s740_s1 = inlined_call_operand.vmem [shape: bf16[4,32], index: 1, kind: input, shape index: {}]   ;;  %s741_s2 = inlined_call_operand.vmem [shape: f32[1,32], index: 2, kind: input, shape index: {}]   ;;  %s742_s3 = inlined_call_operand.hbm [shape: f32[128,32], index: 3, kind: output, shape index: {}]  }
   0x1   :  { %10 = vsyncpa [#allocation3 + $0x1], 0  ;;  %s625_s12 = smov 0   ;;  %s627_s13 = smov 0  }
   0x2   :  { %s629_s14 = smov 0   ;;  %s631_s15 = smov 0  }
   0x3   :  { %s633_s16 = smov 0   ;;  %s635_s17 = smov 0  }
   0x4 LB: > { %s422_s18 = sadd.s32 4294967295, %s601_s17   ;;  %s423_s19 = sadd.s32 4294967294, %s601_s17   ;;  %s601_s17 = sphi %s635_s17, %s16_s17   ;;  %s597_s16 = sphi %s633_s16, %s749_s16   ;;  %s593_s15 = sphi %s631_s15, %s748_s15   ;;  %s589_s14 = sphi %s629_s14, %s747_s14   ;;  %s585_s13 = sphi %s627_s13, %s746_s13   ;;  %s581_s12 = sphi %s625_s12, %s745_s12  }
   0x5   : > { %s28_s20 = sadd.s32 1, %s597_s16  ;;  %s115_s21 = sadd.s32 1, %s589_s14 }
   0x6   : > { %p30_p0 = scmp.ge.s32.totalorder %s28_s20, 2  ;;  %p125_p1 = scmp.ne.s32.totalorder %s589_s14, %s585_s13 }
   0x7   : > { %p126_p2 = scmp.eq.s32.totalorder %s422_s18, 1  ;;  %p131_p3 = scmp.ne.s32.totalorder %s585_s13, %s581_s12 }
   0x8   : > { %s751_s20 = smov (%p30_p0, %s28_s20), 0  ;;  %p132_p5 = scmp.eq.s32.totalorder %s423_s19, 1 }
   0x9   : > { %p665_p4 = por %p126_p2, %p125_p1  ;;  %s110_s23 = ssub.s32 %s597_s16, %s751_s20 }
   0xa   : > { %p428_p6 = scmp.ge.s32.totalorder %s601_s17, 1  ;;  %p113_p7 = scmp.eq.s32.totalorder %s110_s23, 0 }
   0xb   : > { %p672_p8 = por %p132_p5, %p131_p3  ;;  %p172_p9 = scmp.lt.s32.totalorder %s601_s17, 3 }
   0xc   : > { %s678_s25 = scalar_select %p113_p7, %s589_s14, %s115_s21  }
   0xd   : > { %p173_p10 = pnand %p428_p6, %p172_p9 }
   0xe   : > { %s430_s28 = sshll.u32 (!%p173_p10), %s593_s15, 3  ;;  %s200_s6 = sand.u32 (!%p173_p10), 1, %s585_s13  }
   0xf   : > { %176 = sbr.rel (%p173_p10) target bundleno = 173 (0xad), region = 32  ;;  %p204_p11 = scmp.lt.s32.totalorder (!%p173_p10), %s430_s28, 15 }
  0x10   : > { %s429_s7 = sshll.u32 (!%p173_p10), %s200_s6, 6  ;;  %s461_s11 = sshll.u32 (!%p173_p10), %s593_s15, 6 }
  0x11   : > { %s202_s10 = scalar_lea.vmem (!%p173_p10), [#allocation2], %s429_s7  ;;  %s319_s21 = scalar_lea.hbm (!%p173_p10), %s742_s3, %s461_s11 }
  0x12   : > { %s320_s15 = sshll.u32 (!%p173_p10), %s202_s10, 4  ;;  %s322_s23 = sshll.u32 (!%p173_p10), %s319_s21, 4  ;;  %s321_s15 = int_to_ptr.vmem [resolvable:$true] %s320_s15  ;;  %s323_s23 = int_to_ptr.hbm [resolvable:$true] %s322_s23 }
  0x13   : > { %s307_s26 = scalar_lea.sflag (!%p173_p10), [#allocation3], %s200_s6  ;;  %s537_s27 = sshra.s32 (!%p173_p10), %s323_s23, 4  ;;  %s538_s27 = int_to_ptr.hbm [resolvable:$true] %s537_s27 }
  0x14   : > { %v226_v0 = vld [vmem:[%s740_s1] sm:$0x3]  ;;  %vm264_vm0 = vcmask 1041408   ;;  %s753_s28 = smov (!%p204_p11, %s430_s28), 15  ;;  %vm251_vm1 = vcmask 31744   ;;  %vm297_vm2 = vcmask 261120   ;;  %p544_p1 = scmp.lt.s32.totalorder %s538_s27, %s742_s3 }
  0x15   : > { %v266_v1 = vsel %vm264_vm0, %v226_v0, 0  ;;  %s431_s29 = sshll.u32 %s753_s28, 2  ;;  %v522_v6 = vld [vmem:[%s741_s2] ss:$0 sm:$0xff]  ;;  %s539_s28 = scalar_lea.hbm %s538_s27, 64 }
  0x16   : > { %275 = vmatpush.bf16.msra.mxu0 %v266_v1  ;;  %462 = vmatpush.bf16.msra.mxu1 %v266_v1  ;;  %s207_s5 = scalar_lea.vmem %s739_s0, %s431_s29  ;;  %p540_p12 = scmp.ne.s32.totalorder %s538_s27, %s539_s28 }
  0x17   : > { %463 = vmatpush.bf16.msra.mxu2 %v266_v1  ;;  %464 = vmatpush.bf16.msra.mxu3 %v266_v1  ;;  %v457_v2 = vld [vmem:[%s207_s5] sm:$0xff]  ;;  %v458_v3 = vld [vmem:[%s207_s5 + $0x8] sm:$0xff]  ;;  %v459_v4 = vld [vmem:[%s207_s5 + $0x10] sm:$0xff]  ;;  %s543_s4 = scalar_lea.hbm %s742_s3, 128 }
  0x18   : > { %v460_v5 = vld [vmem:[%s207_s5 + $0x18] sm:$0xff]  ;;  %p541_p13 = pnand %p540_p12, %p665_p4  ;;  %p545_p2 = scmp.lt.s32.totalorder %s543_s4, %s539_s28 }
  0x19   : > { %448 = vmatmul.msk.bf16.vlgmr.msra.gmra.mxu0 %vm251_vm1, %v457_v2  ;;  %449 = vmatmul.msk.bf16.vlgmr.msra.gmra.mxu1 %vm251_vm1, %v458_v3 }
  0x1a   : > { %450 = vmatmul.msk.bf16.vlgmr.msra.gmra.mxu2 %vm251_vm1, %v459_v4  ;;  %451 = vmatmul.msk.bf16.vlgmr.msra.gmra.mxu3 %vm251_vm1, %v460_v5  ;;  %p542_p0 = pneg %p541_p13  ;;  %p546_p3 = por %p545_p2, %p544_p1 }
  0x1c   : > { %p547_p5 = pnand %p546_p3, %p542_p0 }
  0x96   : > { %v277_v7 = vpop.f32.mrf.mxu0  ;;  %v282_v8 = vpop.f32.mrf.mxu1 }
  0x97   : > { %v278_v9 = vadd.f32 %v522_v6, %v277_v7  ;;  %v283_v10 = vadd.f32 %v522_v6, %v282_v8 }
  0x99   : > { %298 = vst.msk [vmem:[%s202_s10] sm:$0xff] %vm297_vm2, %v278_v9 }
  0x9a   : > { %300 = vst.msk [vmem:[%s202_s10 + $0x10] sm:$0xff] %vm297_vm2, %v283_v10 }
  0x9d   : > { %v287_v11 = vpop.f32.mrf.mxu2  ;;  %v292_v12 = vpop.f32.mrf.mxu3 }
  0x9e   : > { %v288_v13 = vadd.f32 %v522_v6, %v287_v11  ;;  %v293_v14 = vadd.f32 %v522_v6, %v292_v12  ;;  %v279_v15 = vpop.f32.mrf.mxu0  ;;  %v284_v16 = vpop.f32.mrf.mxu1 }
  0x9f   : > { %v280_v17 = vadd.f32 %v522_v6, %v279_v15  ;;  %v285_v18 = vadd.f32 %v522_v6, %v284_v16 }
  0xa0   : > { %302 = vst.msk [vmem:[%s202_s10 + $0x20] sm:$0xff] %vm297_vm2, %v288_v13 }
  0xa1   : > { %304 = vst.msk [vmem:[%s202_s10 + $0x30] sm:$0xff] %vm297_vm2, %v293_v14 }
  0xa2   : > { %299 = vst.msk [vmem:[%s202_s10 + $0x8] sm:$0xff] %vm297_vm2, %v280_v17 }
  0xa3   : > { %301 = vst.msk [vmem:[%s202_s10 + $0x18] sm:$0xff] %vm297_vm2, %v285_v18 }
  0xa5   : > { %v289_v19 = vpop.f32.mrf.mxu2  ;;  %v294_v20 = vpop.f32.mrf.mxu3 }
  0xa6   : > { %v290_v21 = vadd.f32 %v522_v6, %v289_v19  ;;  %v295_v22 = vadd.f32 %v522_v6, %v294_v20 }
  0xa8   : > { %303 = vst.msk [vmem:[%s202_s10 + $0x28] sm:$0xff] %vm297_vm2, %v290_v21 }
  0xa9   : > { %305 = vst.msk [vmem:[%s202_s10 + $0x38] sm:$0xff] %vm297_vm2, %v295_v22 }
  0xaa   : > { %550 = shalt.err (!%p547_p5)
}
  0xab   : > { %s603_s6 = smov 128   ;;  %s604_s8 = smov 8  }
  0xac   : > { %465 = dma.vmem_to_hbm [thread:$0]  (%p665_p4), %s321_s15, 1024, %s323_s23, %s307_s26, %s603_s6, %s603_s6, %s604_s8  }
  0xad PF: > { %p471_p6 = scmp.ge.s32.totalorder %s601_s17, 2  ;;  %s337_s9 = sand.u32 1, %s581_s12  }
  0xae   : > { %s338_s10 = scalar_lea.sflag [#allocation3], %s337_s9 }
  0xaf   : > { %p468_p7 = pnand %p471_p6, %p672_p8 }
  0xb1   : > { %p469_p9 = pneg %p468_p7 }
  0xb3   : > { %576 = dma.done.wait (%p469_p9), %s338_s10, 1024  }
  0xb4   : > { %578 = vsyncadd (%p469_p9), %s338_s10, 4294966272  ;;  %s16_s17 = sadd.s32 1, %s601_s17   ;;  %s745_s12 = smov %s585_s13 }
  0xb5   : > { %p13_p10 = scmp.ge.s32.totalorder %s16_s17, 4   ;;  %s746_s13 = smov %s589_s14 }
  0xb6   : > { %s747_s14 = smov %s678_s25  ;;  %s748_s15 = smov %s597_s16 }
  0xb7   : > { %s749_s16 = smov %s751_s20  ;;  %15 = sbr.rel (!%p13_p10) target bundleno = 4 (0x4), region = 73 }
  0xbc   :  { %344 = vsyncpa [#allocation3], 1 }
  0xbd   :  { %346 = vsyncpa [#allocation3 + $0x1], 1 }

</bundles_post_ra>
